<compile_context>
chip_gen: v5e
topology: v5e:2x2
jax: 0.10.0
libtpu: 0.0.40
codegen_flags: <defaults>
</compile_context>

<pallas_src>
import jax
import jax.numpy as jnp
from jax.experimental import pallas as pl
from jax.experimental.pallas import tpu as pltpu


def _postprocess_kernel(logits_ref,   # VMEM in : (Bb, Q, C) native dtype
                        bbox_ref,     # VMEM in : (Bb, Q, 4) native dtype (cx, cy, w, h)
                        size_ref,     # VMEM in : (Bb, 2)    [img_h, img_w]
                        scores_ref,   # VMEM out: (Bb, Q)    f32
                        labels_ref,   # VMEM out: (Bb, Q)    i32
                        boxes_ref):   # VMEM out: (Bb, Q, 4) f32 (x0, y0, x1, y1) scaled
    # Cast to f32 in VMEM; inputs stay in their native dtype in HBM (no wrapper
    # astype pass, and bf16 logits only cost half the DMA bytes).
    logits = logits_ref[...].astype(jnp.float32)                    # (Bb, Q, C)
    C = logits.shape[-1]

    cls_iota = jax.lax.broadcasted_iota(jnp.int32, logits.shape, 2)
    fg = cls_iota < (C - 1)                                          # drop "no-object"

    # Logit-domain max / argmax (exp is monotonic; ties are preserved).
    logit_fg = jnp.where(fg, logits, -jnp.inf)                       # (Bb, Q, C)
    m_fg = jnp.max(logit_fg, axis=-1, keepdims=True)                 # (Bb, Q, 1)
    m = jnp.max(logits, axis=-1, keepdims=True)                      # (Bb, Q, 1)
    denom = jnp.sum(jnp.exp(logits - m), axis=-1)                    # (Bb, Q)

    # scores = softmax(logits)[..., :-1].max(-1) = exp(m_fg - m) / sum(exp(logits - m))
    scores_ref[...] = jnp.exp(m_fg[..., 0] - m[..., 0]) * pl.reciprocal(
        denom, approx=True)
    # labels = first foreground index attaining the max (matches argmax tie-break)
    labels_ref[...] = jnp.min(
        jnp.where(logit_fg == m_fg, cls_iota, C), axis=-1).astype(jnp.int32)

    # box_cxcywh_to_xyxy + per-image scaling on the native (Bb, Q, 4) layout;
    # one single full-block store.
    bb = bbox_ref[...].astype(jnp.float32)                           # (Bb, Q, 4)
    cxcy = bb[..., 0:2]
    half = 0.5 * bb[..., 2:4]
    xyxy = jnp.concatenate([cxcy - half, cxcy + half], axis=-1)      # (Bb, Q, 4)

    ts = size_ref[...].astype(jnp.float32)                           # (Bb, 2) [h, w]
    img_h = ts[:, 0:1]
    img_w = ts[:, 1:2]
    scale = jnp.concatenate([img_w, img_h, img_w, img_h], axis=-1)   # (Bb, 4)
    boxes_ref[...] = xyxy * scale[:, None, :]


def _choose_b_block(B, Q, C, logit_bytes, box_bytes,
                    vmem_budget=8 << 20, min_block_bytes=256 << 10):
    """Pick a batch block: prefer >=4 grid steps (megacore + double-buffer),
    then >=2, then a single step; blocks must be multiples of 8 (or == B),
    stay >= ~256 KB when split, and fit the VMEM budget with 2x buffering."""
    per_b = (Q * C * logit_bytes          # logits in
             + Q * 4 * box_bytes          # boxes in
             + 2 * 4                      # target size in
             + Q * 4 + Q * 4 + Q * 4 * 4)  # scores / labels / boxes out
    cands = sorted({d for d in range(8, B + 1, 8) if B % d == 0} | {B})

    def fits(d):
        return 2 * d * per_b <= vmem_budget   # 2x: BlockSpec double-buffering

    for min_steps in (4, 2, 1):
        viable = [d for d in cands
                  if fits(d) and B // d >= min_steps
                  and (d * per_b >= min_block_bytes or min_steps == 1)]
        if viable:
            return max(viable)
    return min(cands)   # clamp to the smallest legal block if budget is exceeded


def post_process(pred_logits, pred_boxes, target_sizes):
    """JAX/Pallas equivalent of PostProcess.forward (nms=False path)."""
    B, Q, C = pred_logits.shape
    assert pred_boxes.shape == (B, Q, 4)
    assert target_sizes.shape == (B, 2)

    b_block = _choose_b_block(
        B, Q, C,
        jnp.dtype(pred_logits.dtype).itemsize,
        jnp.dtype(pred_boxes.dtype).itemsize)
    assert B % b_block == 0
    grid = (B // b_block,)

    grid_spec = pltpu.PrefetchScalarGridSpec(
        num_scalar_prefetch=0,
        grid=grid,
        in_specs=[
            pl.BlockSpec((b_block, Q, C), lambda i: (i, 0, 0)),   # logits (native dtype)
            pl.BlockSpec((b_block, Q, 4), lambda i: (i, 0, 0)),   # boxes  (native dtype)
            pl.BlockSpec((b_block, 2), lambda i: (i, 0)),         # target sizes
        ],
        out_specs=[
            pl.BlockSpec((b_block, Q), lambda i: (i, 0)),         # scores
            pl.BlockSpec((b_block, Q), lambda i: (i, 0)),         # labels
            pl.BlockSpec((b_block, Q, 4), lambda i: (i, 0, 0)),   # boxes xyxy scaled
        ],
    )

    scores, labels, boxes = pl.pallas_call(
        _postprocess_kernel,
        grid_spec=grid_spec,
        out_shape=(
            jax.ShapeDtypeStruct((B, Q), jnp.float32),
            jax.ShapeDtypeStruct((B, Q), jnp.int32),
            jax.ShapeDtypeStruct((B, Q, 4), jnp.float32),
        ),
        compiler_params=pltpu.CompilerParams(
            dimension_semantics=("parallel",)),
    )(pred_logits, pred_boxes, target_sizes)

    return scores, labels, boxes


def _reference(pred_logits, pred_boxes, target_sizes):
    prob = jax.nn.softmax(pred_logits.astype(jnp.float32), axis=-1)
    scores = jnp.max(prob[..., :-1], axis=-1)
    labels = jnp.argmax(prob[..., :-1], axis=-1).astype(jnp.int32)
    cx, cy, w, h = jnp.split(pred_boxes.astype(jnp.float32), 4, axis=-1)
    boxes = jnp.concatenate(
        [cx - 0.5 * w, cy - 0.5 * h, cx + 0.5 * w, cy + 0.5 * h], axis=-1)
    img_h, img_w = target_sizes[:, 0], target_sizes[:, 1]
    scale_fct = jnp.stack([img_w, img_h, img_w, img_h], axis=1).astype(jnp.float32)
    boxes = boxes * scale_fct[:, None, :]
    return scores, labels, boxes


if __name__ == "__main__":
    B, Q, C = 2, 16, 8          # small shapes: 2 images, 16 queries, 7 classes + no-object
    key = jax.random.PRNGKey(0)
    k1, k2 = jax.random.split(key)
    pred_logits = jax.random.normal(k1, (B, Q, C), dtype=jnp.float32)
    pred_boxes = jax.random.uniform(k2, (B, Q, 4), dtype=jnp.float32,
                                    minval=0.05, maxval=0.5)
    target_sizes = jnp.array([[480.0, 640.0], [600.0, 800.0]], dtype=jnp.float32)

    scores, labels, boxes = post_process(pred_logits, pred_boxes, target_sizes)
    jax.block_until_ready((scores, labels, boxes))

    # correctness check against pure-JAX reference
    s_ref, l_ref, b_ref = _reference(pred_logits, pred_boxes, target_sizes)
    # scores use the EUP approximate reciprocal -> relaxed tolerance
    assert jnp.allclose(scores, s_ref, rtol=5e-3, atol=1e-4), "scores mismatch"
    assert jnp.array_equal(labels, l_ref), "labels mismatch"
    assert jnp.allclose(boxes, b_ref, rtol=1e-5, atol=1e-4), "boxes mismatch"

    # COCO-style per-image result dicts (same structure as the torch module's output)
    results = [{"scores": s, "labels": l, "boxes": b}
               for s, l, b in zip(scores, labels, boxes)]
    assert len(results) == B

    print("KERNEL_OK")
</pallas_src>

<mosaic_0001>
module attributes {stable_mosaic.version = 11 : i64} {
  func.func @_postprocess_kernel(%arg0: i32, %arg1: memref<2x16x8xf32, #tpu.memory_space<vmem>>, %arg2: memref<2x16x4xf32, #tpu.memory_space<vmem>>, %arg3: memref<2x2xf32, #tpu.memory_space<vmem>>, %arg4: memref<2x16xf32, #tpu.memory_space<vmem>>, %arg5: memref<2x16xi32, #tpu.memory_space<vmem>>, %arg6: memref<2x16x4xf32, #tpu.memory_space<vmem>>) attributes {dimension_semantics = [#tpu.dimension_semantics<parallel>], iteration_bounds = array<i64: 1>, scalar_prefetch = 0 : i64, scratch_operands = 0 : i64, tpu.core_type = #tpu.core_type<tc>, window_params = [{transform_indices = @transform_0, window_bounds = array<i64: 2, 16, 8>}, {transform_indices = @transform_1, window_bounds = array<i64: 2, 16, 4>}, {transform_indices = @transform_2, window_bounds = array<i64: 2, 2>}, {transform_indices = @transform_3, window_bounds = array<i64: 2, 16>}, {transform_indices = @transform_4, window_bounds = array<i64: 2, 16>}, {transform_indices = @transform_5, window_bounds = array<i64: 2, 16, 4>}]} {
    %c0 = arith.constant 0 : index
    %c0_0 = arith.constant 0 : index
    %c0_1 = arith.constant 0 : index
    %0 = vector.load %arg1[%c0, %c0_0, %c0_1] : memref<2x16x8xf32, #tpu.memory_space<vmem>>, vector<2x16x8xf32>
    %1 = tpu.iota {dimensions = array<i32: 2>} : vector<2x16x8xi32>
    %c7_i32 = arith.constant 7 : i32
    %2 = vector.broadcast %c7_i32 : i32 to vector<2x16x8xi32>
    %3 = arith.cmpi slt, %1, %2 : vector<2x16x8xi32>
    %cst = arith.constant 0xFF800000 : f32
    %4 = vector.broadcast %cst : f32 to vector<2x16x8xf32>
    %5 = arith.select %3, %0, %4 : vector<2x16x8xi1>, vector<2x16x8xf32>
    %cst_2 = arith.constant dense<0xFF800000> : vector<2x16xf32>
    %6 = vector.multi_reduction <maximumf>, %5, %cst_2 [2] : vector<2x16x8xf32> to vector<2x16xf32>
    %7 = vector.shape_cast %6 : vector<2x16xf32> to vector<2x16x1xf32>
    %cst_3 = arith.constant dense<0xFF800000> : vector<2x16xf32>
    %8 = vector.multi_reduction <maximumf>, %0, %cst_3 [2] : vector<2x16x8xf32> to vector<2x16xf32>
    %9 = vector.shape_cast %8 : vector<2x16xf32> to vector<2x16x1xf32>
    %10 = vector.broadcast %9 : vector<2x16x1xf32> to vector<2x16x8xf32>
    %11 = arith.subf %0, %10 : vector<2x16x8xf32>
    %12 = math.exp %11 : vector<2x16x8xf32>
    %cst_4 = arith.constant dense<0.000000e+00> : vector<2x16xf32>
    %13 = vector.multi_reduction <add>, %12, %cst_4 [2] : vector<2x16x8xf32> to vector<2x16xf32>
    %14 = vector.shape_cast %7 : vector<2x16x1xf32> to vector<2x16xf32>
    %15 = vector.shape_cast %9 : vector<2x16x1xf32> to vector<2x16xf32>
    %16 = arith.subf %14, %15 : vector<2x16xf32>
    %17 = math.exp %16 : vector<2x16xf32>
    %18 = tpu.reciprocal %13 {approx = true} : vector<2x16xf32> -> vector<2x16xf32>
    %19 = arith.mulf %17, %18 : vector<2x16xf32>
    %c0_5 = arith.constant 0 : index
    %c0_6 = arith.constant 0 : index
    %20 = vector.load %arg4[%c0_5, %c0_6] : memref<2x16xf32, #tpu.memory_space<vmem>>, vector<2x16xf32>
    tpu.vector_store %arg4[%c0_5, %c0_6], %19 {strides = array<i32>} : memref<2x16xf32, #tpu.memory_space<vmem>>, vector<2x16xf32>,
    %21 = vector.broadcast %7 : vector<2x16x1xf32> to vector<2x16x8xf32>
    %22 = arith.cmpf oeq, %5, %21 : vector<2x16x8xf32>
    %c8_i32 = arith.constant 8 : i32
    %23 = vector.broadcast %c8_i32 : i32 to vector<2x16x8xi32>
    %24 = arith.select %22, %1, %23 : vector<2x16x8xi1>, vector<2x16x8xi32>
    %cst_7 = arith.constant dense<2147483647> : vector<2x16xi32>
    %25 = vector.multi_reduction <minsi>, %24, %cst_7 [2] : vector<2x16x8xi32> to vector<2x16xi32>
    %c0_8 = arith.constant 0 : index
    %c0_9 = arith.constant 0 : index
    %26 = vector.load %arg5[%c0_8, %c0_9] : memref<2x16xi32, #tpu.memory_space<vmem>>, vector<2x16xi32>
    tpu.vector_store %arg5[%c0_8, %c0_9], %25 {strides = array<i32>} : memref<2x16xi32, #tpu.memory_space<vmem>>, vector<2x16xi32>,
    %c0_10 = arith.constant 0 : index
    %c0_11 = arith.constant 0 : index
    %c0_12 = arith.constant 0 : index
    %27 = vector.load %arg2[%c0_10, %c0_11, %c0_12] : memref<2x16x4xf32, #tpu.memory_space<vmem>>, vector<2x16x4xf32>
    %28 = vector.extract_strided_slice %27 {offsets = [0, 0, 0], sizes = [2, 16, 2], strides = [1, 1, 1]} : vector<2x16x4xf32> to vector<2x16x2xf32>
    %29 = vector.extract_strided_slice %27 {offsets = [0, 0, 2], sizes = [2, 16, 2], strides = [1, 1, 1]} : vector<2x16x4xf32> to vector<2x16x2xf32>
    %cst_13 = arith.constant 5.000000e-01 : f32
    %30 = vector.broadcast %cst_13 : f32 to vector<2x16x2xf32>
    %31 = arith.mulf %30, %29 : vector<2x16x2xf32>
    %32 = arith.subf %28, %31 : vector<2x16x2xf32>
    %33 = arith.addf %28, %31 : vector<2x16x2xf32>
    %34 = tpu.concatenate %32, %33 in 2 : vector<2x16x2xf32>, vector<2x16x2xf32> -> vector<2x16x4xf32>
    %c0_14 = arith.constant 0 : index
    %c0_15 = arith.constant 0 : index
    %35 = vector.load %arg3[%c0_14, %c0_15] : memref<2x2xf32, #tpu.memory_space<vmem>>, vector<2x2xf32>
    %36 = vector.extract_strided_slice %35 {offsets = [0, 0], sizes = [2, 1], strides = [1, 1]} : vector<2x2xf32> to vector<2x1xf32>
    %37 = vector.extract_strided_slice %35 {offsets = [0, 1], sizes = [2, 1], strides = [1, 1]} : vector<2x2xf32> to vector<2x1xf32>
    %38 = tpu.concatenate %37, %36, %37, %36 in 1 : vector<2x1xf32>, vector<2x1xf32>, vector<2x1xf32>, vector<2x1xf32> -> vector<2x4xf32>
    %39 = vector.shape_cast %38 : vector<2x4xf32> to vector<2x1x4xf32>
    %40 = vector.broadcast %39 : vector<2x1x4xf32> to vector<2x16x4xf32>
    %41 = arith.mulf %34, %40 : vector<2x16x4xf32>
    %c0_16 = arith.constant 0 : index
    %c0_17 = arith.constant 0 : index
    %c0_18 = arith.constant 0 : index
    %42 = vector.load %arg6[%c0_16, %c0_17, %c0_18] : memref<2x16x4xf32, #tpu.memory_space<vmem>>, vector<2x16x4xf32>
    tpu.vector_store %arg6[%c0_16, %c0_17, %c0_18], %41 {strides = array<i32>} : memref<2x16x4xf32, #tpu.memory_space<vmem>>, vector<2x16x4xf32>,
    return
  }
  func.func @transform_0(%arg0: i32) -> (i32, i32, i32) {
    %c0_i32 = arith.constant 0 : i32
    %c0_i32_0 = arith.constant 0 : i32
    %c0_i32_1 = arith.constant 0 : i32
    return %arg0, %c0_i32, %c0_i32_0 : i32, i32, i32
  }
  func.func @transform_1(%arg0: i32) -> (i32, i32, i32) {
    %c0_i32 = arith.constant 0 : i32
    %c0_i32_0 = arith.constant 0 : i32
    %c0_i32_1 = arith.constant 0 : i32
    return %arg0, %c0_i32, %c0_i32_0 : i32, i32, i32
  }
  func.func @transform_2(%arg0: i32) -> (i32, i32) {
    %c0_i32 = arith.constant 0 : i32
    %c0_i32_0 = arith.constant 0 : i32
    return %arg0, %c0_i32 : i32, i32
  }
  func.func @transform_3(%arg0: i32) -> (i32, i32) {
    %c0_i32 = arith.constant 0 : i32
    %c0_i32_0 = arith.constant 0 : i32
    return %arg0, %c0_i32 : i32, i32
  }
  func.func @transform_4(%arg0: i32) -> (i32, i32) {
    %c0_i32 = arith.constant 0 : i32
    %c0_i32_0 = arith.constant 0 : i32
    return %arg0, %c0_i32 : i32, i32
  }
  func.func @transform_5(%arg0: i32) -> (i32, i32, i32) {
    %c0_i32 = arith.constant 0 : i32
    %c0_i32_0 = arith.constant 0 : i32
    %c0_i32_1 = arith.constant 0 : i32
    return %arg0, %c0_i32, %c0_i32_0 : i32, i32, i32
  }
}

</mosaic_0001>

<bundles_post_ra>
// kernel: tpu_custom_call.1
= control target key start
LH: loop header
LB: loop body
LE: loop exit
PB: predicated region body
PF: predicated region fallthrough
CT: control target
= control target key end

     0   :  { %11 = vsyncpa [#allocation3], 0  ;;  %vm30_vm0 = vcmask 64512   ;;  %v23_v1 = vlaneseq  ;;  %s664_s0 = inlined_call_operand.vmem [shape: f32[2,16,8], index: 0, kind: input, shape index: {}]   ;;  %s665_s1 = inlined_call_operand.vmem [shape: f32[2,16,4], index: 1, kind: input, shape index: {}]   ;;  %s666_s2 = inlined_call_operand.vmem [shape: f32[2,2], index: 2, kind: input, shape index: {}]   ;;  %s667_s3 = inlined_call_operand.hbm [shape: f32[2,16], index: 3, kind: output, shape index: {0}]   ;;  %s668_s4 = inlined_call_operand.hbm [shape: s32[2,16], index: 4, kind: output, shape index: {1}]   ;;  %s669_s5 = inlined_call_operand.vmem [shape: f32[2,16,4], index: 5, kind: output, shape index: {2}]  }
   0x1   :  { %v435_v0 = vld [vmem:[%s664_s0] sm:$0xff]  ;;  %v442_v3 = vld [vmem:[%s664_s0 + $0x10] sm:$0xff] }
   0x2   :  { %v43_v2 = vsel %vm30_vm0, %v435_v0, -inf  ;;  %v444_v4 = vand.u32 127, %v23_v1 }
   0x3   :  { %44 = vmax.xlane.f32.xlu2 %v43_v2 }
   0x4   :  { %12 = vsyncpa [#allocation5], 0  ;;  %vm25_vm1 = vcmp.lt.s32.totalorder %v444_v4, 7  ;;  %v20_v5 = vld [vmem:[%s664_s0 + $0x8] sm:$0xff]  ;;  %v457_v10 = vld [vmem:[%s664_s0 + $0x18] sm:$0xff]  ;;  %v49_v16 = vsel %vm30_vm0, %v442_v3, -inf }
   0x5   :  { %v28_v6 = vsel %vm25_vm1, %v442_v3, -inf  ;;  %v26_v7 = vsel %vm25_vm1, %v435_v0, -inf  ;;  %v46_v11 = vsel %vm30_vm0, %v20_v5, -inf  ;;  %v29_v12 = vsel %vm25_vm1, %v457_v10, -inf  ;;  %v473_v18 = vld [vmem:[%s665_s1 + $0x10] sm:$0xff]  ;;  %s395_s27 = smov 126  }
   0x6   :  { %v37_v8 = vsel %vm30_vm0, %v28_v6, -inf  ;;  %v31_v9 = vsel %vm30_vm0, %v26_v7, -inf  ;;  %v461_v13 = vsel %vm25_vm1, %v20_v5, -inf  ;;  %v40_v14 = vsel %vm30_vm0, %v29_v12, -inf  ;;  %v479_v20 = vld [vmem:[%s665_s1] sm:$0xff]  ;;  %v488_v23 = vld [vmem:[%s665_s1 + $0x8] sm:$0xff] }
   0x7   :  { %38 = vmax.xlane.f32.xlu1 %v37_v8  ;;  %32 = vmax.xlane.f32.xlu0 %v31_v9  ;;  %v34_v15 = vsel %vm30_vm0, %v461_v13, -inf  ;;  %v52_v17 = vsel %vm30_vm0, %v457_v10, -inf  ;;  %v198_v19 = vmul.f32 0.5, %v473_v18  ;;  %v196_v21 = vmul.f32 0.5, %v479_v20  ;;  %v245_v22 = vld [vmem:[%s666_s2] sm:$0x3] }
   0x8   :  { %s396_s9 = smov 1   ;;  %v197_v24 = vmul.f32 0.5, %v488_v23  ;;  %v494_v25 = vld [vmem:[%s665_s1 + $0x18] sm:$0xff]  ;;  %s397_s2 = smov 3   ;;  %vm256_vm9 = vcmask 7168   ;;  %vm240_vm10 = vcmask 15360  }
   0x9   :  { %v199_v26 = vmul.f32 0.5, %v494_v25  ;;  %s398_s12 = smov 127   ;;  %s399_s1 = smov 2   ;;  %vm259_vm11 = vcmask 23552   ;;  %vm106_vm12 = vcmask 130112   ;;  %vm271_vm13 = vcmask 31744  }
   0xa   :  { %s400_s15 = smov [#allocation2]   ;;  %s283_s19 = sshll.u32 %s667_s3, 4  ;;  %vm111_vm15 = vcmask 1041409   ;;  %s284_s19 = int_to_ptr.hbm [resolvable:$true] %s283_s19 }
   0xb   :  { %47 = vmax.xlane.f32.xlu2 %v46_v11  ;;  %s281_s16 = sshll.u32 %s400_s15, 4  ;;  %s401_s23 = smov [#allocation4]   ;;  %s282_s16 = int_to_ptr.vmem [resolvable:$true] %s281_s16 }
   0xc   :  { %s292_s24 = sshll.u32 %s401_s23, 4  ;;  %s294_s26 = sshll.u32 %s668_s4, 4  ;;  %s293_s24 = int_to_ptr.vmem [resolvable:$true] %s292_s24  ;;  %s295_s26 = int_to_ptr.hbm [resolvable:$true] %s294_s26 }
   0xf   :  { %41 = vmax.xlane.f32.xlu1 %v40_v14  ;;  %35 = vmax.xlane.f32.xlu0 %v34_v15 }
  0x17   :  { %50 = vmax.xlane.f32.xlu0 %v49_v16  ;;  %53 = vmax.xlane.f32.xlu1 %v52_v17 }
  0x23   :  { %208 = vrot.lane.b32.xlu2 %v198_v19, %s395_s27 }
  0x2b   :  { %250 = vrot.lane.b32.xlu2 %v245_v22, %s396_s9  ;;  %204 = vrot.lane.b32.xlu0 %v196_v21, %s395_s27 }
  0x30   :  { %206 = vrot.lane.b32.xlu1 %v197_v24, %s395_s27 }
  0x33   :  { %210 = vrot.lane.b32.xlu0 %v199_v26, %s395_s27 }
  0x38   :  { %253 = vrot.lane.b32.xlu1 %v245_v22, %s397_s2 }
  0x3b   :  { %247 = vrot.lane.b32.xlu0 %v245_v22, %s398_s12 }
  0x76   :  { %v497_v27 = vpop.xlane.xlu2 %44 }
  0x77   :  { %v55_v36 = vsub.f32 %v435_v0, %v497_v27 }
  0x79   :  { %v59_v43 = vmul.f32 1.442695, %v55_v36 }
  0x7a   :  { %v499_v28 = vpop.xlane.xlu1 %38  ;;  %v501_v29 = vpop.xlane.xlu0 %32 }
  0x7b   :  { %vm118_vm2 = vcmp.eq.f32.partialorder %v28_v6, %v499_v28  ;;  %v79_v30 = vsub.f32 %v501_v29, %v497_v27  ;;  %vm116_vm3 = vcmp.eq.f32.partialorder %v26_v7, %v501_v29 }
  0x7c   :  { %v122_v31 = vsel %vm118_vm2, %v444_v4, 8  ;;  %v120_v32 = vsel %vm116_vm3, %v444_v4, 8 }
  0x7d   :  { %v512_v34 = vsel %vm30_vm0, %v122_v31, 2147483647  ;;  %v515_v35 = vsel %vm30_vm0, %v120_v32, 2147483647 }
  0x7e   :  { %v509_v33 = vpop.xlane.xlu2 %47  ;;  %v156_v38 = vshra.s32 %v512_v34, 16  ;;  %v126_v39 = vshra.s32 %v515_v35, 16  ;;  %v155_v14 = vand.u32 65535, %v512_v34  ;;  %v125_v15 = vand.u32 65535, %v515_v35 }
  0x7f   :  { %v56_v37 = vsub.f32 %v20_v5, %v509_v33 }
  0x80   :  { %v158_v41 = vcvt.s32.f32 %v156_v38  ;;  %v128_v42 = vcvt.s32.f32 %v126_v39  ;;  %v157_v19 = vcvt.s32.f32 %v155_v14  ;;  %v127_v21 = vcvt.s32.f32 %v125_v15 }
  0x81   :  { %v61_v40 = vmul.f32 1.442695, %v56_v37  ;;  %v83_v37 = vmul.f32 1.442695, %v79_v30 }
  0x82   :  { %159 = vmin.xlane.f32.xlu1 %v158_v41  ;;  %v522_v44 = vpop.xlane.xlu1 %41  ;;  %129 = vmin.xlane.f32.xlu2 %v128_v42  ;;  %v524_v45 = vpop.xlane.xlu0 %35 }
  0x83   :  { %319 = vpow2.f32 %v61_v40  ;;  %vm119_vm4 = vcmp.eq.f32.partialorder %v29_v12, %v522_v44  ;;  %v80_v46 = vsub.f32 %v524_v45, %v509_v33  ;;  %vm117_vm5 = vcmp.eq.f32.partialorder %v461_v13, %v524_v45 }
  0x84   :  { %v123_v47 = vsel %vm119_vm4, %v444_v4, 8  ;;  %321 = vpow2.f32 %v59_v43  ;;  %v121_v1 = vsel %vm117_vm5, %v444_v4, 8 }
  0x85   :  { %v169_v48 = vsel %vm30_vm0, %v123_v47, 2147483647  ;;  %v555_v5 = vsel %vm30_vm0, %v121_v1, 2147483647  ;;  %v85_v36 = vmul.f32 1.442695, %v80_v46 }
  0x86   :  { %v171_v49 = vshra.s32 %v169_v48, 16  ;;  %v141_v7 = vshra.s32 %v555_v5, 16  ;;  %v564_v12 = vpop.permute.xlu2 %208  ;;  %v170_v26 = vand.u32 65535, %v169_v48  ;;  %v583_v46 = vadd.s32 4294967288, %v444_v4 }
  0x88   :  { %v173_v51 = vcvt.s32.f32 %v171_v49  ;;  %v558_v8 = vcvt.s32.f32 %v141_v7  ;;  %v172_v33 = vcvt.s32.f32 %v170_v26 }
  0x89   :  { %v320_v50 = vpop.eup %319 }
  0x8a   :  { %v70_v52 = vsel %vm30_vm0, %v320_v50, 0.0  ;;  %174 = vmin.xlane.f32.xlu2 %v173_v51  ;;  %v532_v53 = vpop.xlane.xlu0 %50  ;;  %v534_v54 = vpop.xlane.xlu1 %53 }
  0x8b   :  { %71 = vadd.xlane.f32.xlu1 %v70_v52  ;;  %v81_v55 = vsub.f32 %v499_v28, %v532_v53  ;;  %v58_v56 = vsub.f32 %v457_v10, %v534_v54  ;;  %v82_v57 = vsub.f32 %v522_v44, %v534_v54  ;;  %v322_v58 = vpop.eup %321  ;;  %v57_v2 = vsub.f32 %v442_v3, %v532_v53 }
  0x8c   :  { %v67_v60 = vsel %vm30_vm0, %v322_v58, 0.0  ;;  %v222_v54 = vadd.f32 %v564_v12, %v473_v18 }
  0x8d   :  { %v65_v59 = vmul.f32 1.442695, %v58_v56  ;;  %v63_v6 = vmul.f32 1.442695, %v57_v2  ;;  %v89_v2 = vmul.f32 1.442695, %v82_v57 }
  0x8e   :  { %v251_v13 = vpop.permute.xlu2 %250 }
  0x8f   :  { %323 = vpow2.f32 %v65_v59 }
  0x90   :  { %325 = vpow2.f32 %v63_v6  ;;  %v87_v6 = vmul.f32 1.442695, %v81_v55 }
  0x92   :  { %68 = vadd.xlane.f32.xlu2 %v67_v60 }
  0x95   :  { %v324_v61 = vpop.eup %323 }
  0x96   :  { %v76_v62 = vsel %vm30_vm0, %v324_v61, 0.0  ;;  %v326_v9 = vpop.eup %325 }
  0x97   :  { %v73_v10 = vsel %vm30_vm0, %v326_v9, 0.0  ;;  %vm114_vm0 = vcmask 123904  }
  0x9a   :  { %77 = vadd.xlane.f32.xlu2 %v76_v62 }
  0x9d   :  { %v544_v63 = vpop.permute.xlu0 %204 }
  0x9e   :  { %v220_v0 = vadd.f32 %v544_v63, %v479_v20 }
  0xa0   :  { %228 = vrot.lane.b32.xlu0 %v220_v0, %s399_s1 }
  0xa2   :  { %v562_v11 = vpop.permute.xlu1 %206 }
  0xa3   :  { %v221_v27 = vadd.f32 %v562_v11, %v488_v23  ;;  %v217_v26 = vsub.f32 %v488_v23, %v562_v11 }
  0xa5   :  { %v574_v31 = vpop.permute.xlu0 %210 }
  0xa6   :  { %v223_v61 = vadd.f32 %v574_v31, %v494_v25  ;;  %v219_v11 = vsub.f32 %v494_v25, %v574_v31 }
  0xaa   :  { %v254_v3 = vpop.permute.xlu1 %253 }
  0xad   :  { %v248_v39 = vpop.permute.xlu0 %247 }
  0xca   :  { %144 = vmin.xlane.f32.xlu0 %v558_v8 }
  0xd2   :  { %74 = vadd.xlane.f32.xlu0 %v73_v10 }
  0xf5   :  { %v568_v16 = vpop.xlane.xlu1 %159  ;;  %v570_v17 = vpop.xlane.xlu2 %129 }
  0xf6   :  { %vm161_vm6 = vcmp.eq.f32.partialorder %v158_v41, %v568_v16  ;;  %vm131_vm7 = vcmp.eq.f32.partialorder %v128_v42, %v570_v17  ;;  %v257_v41 = vsel %vm256_vm9, %v248_v39, %v251_v13  ;;  %v166_v57 = vcvt.f32.s32 %v568_v16 }
  0xf7   :  { %v162_v22 = vsel %vm161_vm6, %v157_v19, inf  ;;  %v132_v24 = vsel %vm131_vm7, %v127_v21, inf  ;;  %v258_v29 = vsel %vm240_vm10, %v257_v41, %v251_v13 }
  0xf8   :  { %163 = vmin.xlane.f32.xlu2 %v162_v22  ;;  %133 = vmin.xlane.f32.xlu1 %v132_v24  ;;  %v588_v48 = vsel %vm259_vm11, %v258_v29, %v254_v3  ;;  %v167_v19 = vshll.u32 %v166_v57, 16 }
  0xf9   :  { %v263_v56 = vperm.slane %v588_v48, 0  ;;  %v262_v23 = vrot.slane %v588_v48, 1 }
  0xfd   :  { %v576_v32 = vpop.xlane.xlu2 %174 }
  0xfe   :  { %vm176_vm8 = vcmp.eq.f32.partialorder %v173_v51, %v576_v32  ;;  %v72_v34 = vpop.xlane.xlu1 %71  ;;  %v216_v51 = vsub.f32 %v479_v20, %v544_v63  ;;  %v140_v20 = vand.u32 65535, %v555_v5  ;;  %v181_v24 = vcvt.f32.s32 %v576_v32 }
  0xff   :  { %v177_v35 = vsel %vm176_vm8, %v172_v33, inf  ;;  %327 = vrcp.f32 %v72_v34 }
 0x100   :  { %178 = vmin.xlane.f32.xlu1 %v177_v35  ;;  %329 = vpow2.f32 %v85_v36  ;;  %v142_v63 = vcvt.s32.f32 %v140_v20  ;;  %v182_v35 = vshll.u32 %v181_v24, 16 }
 0x101   :  { %331 = vpow2.f32 %v83_v37 }
 0x105   :  { %v69_v38 = vpop.xlane.xlu2 %68  ;;  %v328_v40 = vpop.eup %327 }
 0x106   :  { %333 = vrcp.f32 %v69_v38  ;;  %v330_v42 = vpop.eup %329 }
 0x107   :  { %v332_v43 = vpop.eup %331  ;;  %v96_v45 = vmul.f32 %v330_v42, %v328_v40  ;;  %v264_v42 = vperm.slane %v262_v23, 0 }
 0x109   :  { %v105_v50 = vperm.slane %v96_v45, %v583_v46 }
 0x10c   :  { %v334_v47 = vpop.eup %333 }
 0x10d   :  { %v95_v30 = vmul.f32 %v334_v47, %v332_v43  ;;  %v78_v0 = vpop.xlane.xlu2 %77  ;;  %v136_v47 = vcvt.f32.s32 %v570_v17 }
 0x10e   :  { %335 = vrcp.f32 %v78_v0 }
 0x10f   :  { %v103_v49 = vperm.slane %v95_v30, %v444_v4  ;;  %337 = vpow2.f32 %v89_v2  ;;  %v137_v30 = vshll.u32 %v136_v47, 16 }
 0x110   :  { %230 = vrot.lane.b32.xlu2 %v221_v27, %s399_s1  ;;  %339 = vpow2.f32 %v87_v6 }
 0x111   :  { %v107_v52 = vsel %vm106_vm12, %v105_v50, %v103_v49 }
 0x112   :  { %v229_v58 = vpop.permute.xlu0 %228 }
 0x113   :  { %v241_v59 = vsel %vm240_vm10, %v216_v51, %v229_v58  ;;  %v218_v58 = vsub.f32 %v473_v18, %v564_v12 }
 0x114   :  { %v267_v60 = vmul.f32 %v263_v56, %v241_v59  ;;  %v336_v7 = vpop.eup %335 }
 0x115   :  { %v338_v9 = vpop.eup %337 }
 0x116   :  { %272 = vst.msk [vmem:[%s669_s5] sm:$0xff] %vm271_vm13, %v267_v60  ;;  %v340_v10 = vpop.eup %339 }
 0x119   :  { %234 = vrot.lane.b32.xlu1 %v223_v61, %s399_s1 }
 0x13d   :  { %v606_v62 = vpop.xlane.xlu0 %144 }
 0x13e   :  { %vm146_vm14 = vcmp.eq.f32.partialorder %v558_v8, %v606_v62  ;;  %v98_v8 = vmul.f32 %v338_v9, %v336_v7  ;;  %v151_v27 = vcvt.f32.s32 %v606_v62 }
 0x13f   :  { %v147_v1 = vsel %vm146_vm14, %v142_v63, inf }
 0x140   :  { %148 = vmin.xlane.f32.xlu0 %v147_v1  ;;  %v109_v44 = vperm.slane %v98_v8, %v583_v46  ;;  %v152_v49 = vshll.u32 %v151_v27, 16 }
 0x145   :  { %v75_v5 = vpop.xlane.xlu0 %74 }
 0x146   :  { %341 = vrcp.f32 %v75_v5 }
 0x14c   :  { %v342_v3 = vpop.eup %341 }
 0x14d   :  { %v97_v13 = vmul.f32 %v342_v3, %v340_v10 }
 0x14f   :  { %v108_v28 = vperm.slane %v97_v13, %v444_v4 }
 0x151   :  { %v110_v53 = vsel %vm106_vm12, %v109_v44, %v108_v28 }
 0x152   :  { %v112_v55 = vsel %vm111_vm15, %v110_v53, %v107_v52 }
 0x153   :  { %115 = vst.msk [vmem:[#allocation2] sm:$0x3] %vm114_vm0, %v112_v55 }
 0x154   :  { %232 = vrot.lane.b32.xlu0 %v222_v54, %s399_s1  ;;  %286 = dma.vmem_to_hbm [thread:$0]  %s282_s16, 32, %s284_s19, [#allocation3]  }
 0x16b   :  { %v164_v14 = vpop.xlane.xlu2 %163  ;;  %v134_v15 = vpop.xlane.xlu1 %133 }
 0x16c   :  { %v165_v21 = vcvt.f32.s32 %v164_v14  ;;  %v135_v29 = vcvt.f32.s32 %v134_v15 }
 0x16e   :  { %v168_v22 = vadd.s32 %v167_v19, %v165_v21  ;;  %v138_v50 = vadd.s32 %v137_v30, %v135_v29 }
 0x170   :  { %v187_v16 = vperm.slane %v168_v22, %v444_v4  ;;  %v184_v51 = vperm.slane %v138_v50, %v444_v4 }
 0x173   :  { %v231_v33 = vpop.permute.xlu2 %230  ;;  %v179_v34 = vpop.xlane.xlu1 %178 }
 0x174   :  { %v242_v36 = vsel %vm240_vm10, %v217_v26, %v231_v33  ;;  %v180_v37 = vcvt.f32.s32 %v179_v34 }
 0x175   :  { %v268_v38 = vmul.f32 %v263_v56, %v242_v36 }
 0x176   :  { %v183_v39 = vadd.s32 %v182_v35, %v180_v37 }
 0x177   :  { %273 = vst.msk [vmem:[%s669_s5 + $0x8] sm:$0xff] %vm271_vm13, %v268_v38 }
 0x178   :  { %v188_v32 = vperm.slane %v183_v39, %v583_v46 }
 0x17a   :  { %v189_v40 = vsel %vm106_vm12, %v188_v32, %v187_v16 }
 0x18b   :  { %v235_v41 = vpop.permute.xlu1 %234 }
 0x18c   :  { %v244_v43 = vsel %vm240_vm10, %v219_v11, %v235_v41 }
 0x18d   :  { %v270_v45 = vmul.f32 %v264_v42, %v244_v43 }
 0x18f   :  { %275 = vst.msk [vmem:[%s669_s5 + $0x18] sm:$0xff] %vm271_vm13, %v270_v45 }
 0x1b3   :  { %v149_v48 = vpop.xlane.xlu0 %148 }
 0x1b4   :  { %v150_v25 = vcvt.f32.s32 %v149_v48 }
 0x1b6   :  { %v153_v31 = vadd.s32 %v152_v49, %v150_v25 }
 0x1b8   :  { %v185_v52 = vperm.slane %v153_v31, %v583_v46 }
 0x1ba   :  { %v186_v17 = vsel %vm106_vm12, %v185_v52, %v184_v51 }
 0x1bb   :  { %v190_v56 = vsel %vm111_vm15, %v189_v40, %v186_v17 }
 0x1bc   :  { %191 = vst.msk [vmem:[#allocation4] sm:$0x3] %vm114_vm0, %v190_v56 }
 0x1bd   :  { %297 = dma.vmem_to_hbm [thread:$0]  %s293_s24, 32, %s295_s26, [#allocation5]  }
 0x1c6   :  { %v233_v59 = vpop.permute.xlu0 %232 }
 0x1c7   :  { %v243_v60 = vsel %vm240_vm10, %v218_v58, %v233_v59 }
 0x1c8   :  { %v269_v61 = vmul.f32 %v264_v42, %v243_v60 }
 0x1ca   :  { %274 = vst.msk [vmem:[%s669_s5 + $0x10] sm:$0xff] %vm271_vm13, %v269_v61 }
 0x1cb   :  { %391 = dma.done.wait [#allocation3], 32  }
 0x1cc   :  { %392 = vsyncadd [#allocation3], 4294967264 }
 0x1cd   :  { %393 = dma.done.wait [#allocation5], 32  }
 0x1ce   :  { %394 = vsyncadd [#allocation5], 4294967264 }
 0x1cf   :  { %310 = vsyncpa [#allocation3], 1 }
 0x1d0   :  { %311 = vsyncpa [#allocation5], 1 }

</bundles_post_ra>
